<compile_context>
chip_gen: v5e
topology: v5e:2x2
jax: 0.10.0
libtpu: 0.0.40
codegen_flags: <defaults>
</compile_context>

<pallas_src>
import numpy as np
import jax
import jax.numpy as jnp
from jax.experimental import pallas as pl
from jax.experimental.pallas import tpu as pltpu

_MAX_DMA_CHUNKS = 4                 # DMAs kept in flight for large copies
_MIN_BYTES_PER_CHUNK = 512 * 1024   # below this, one DMA has the least overhead


def _chunk_splits(n_rows: int, n_chunks: int):
    """Static (start, size) splits of the leading axis into <= n_chunks pieces."""
    n = max(1, min(n_chunks, n_rows))
    base, rem = divmod(n_rows, n)
    splits, start = [], 0
    for c in range(n):
        size = base + (1 if c < rem else 0)
        if size:
            splits.append((start, size))
            start += size
    return splits


def _make_bypass_kernel(splits):
    """Kernel: start all HBM->HBM chunk DMAs, then wait on all of them."""

    def kernel(x_hbm, o_hbm, sems):
        copies = []
        for c, (start, size) in enumerate(splits):
            cp = pltpu.make_async_copy(
                x_hbm.at[pl.ds(start, size)],
                o_hbm.at[pl.ds(start, size)],
                sems.at[c],
            )
            cp.start()
            copies.append(cp)
        for cp in copies:
            cp.wait()

    return kernel


def _bypass_impl(x: jax.Array) -> jax.Array:
    # Degenerate shapes: nothing to copy / no leading axis to chunk.
    if x.size == 0 or x.ndim == 0:
        return x

    # TODO(synk): if the caller can donate x, skip the kernel entirely and
    # return x — that eliminates 100% of HBM traffic and beats any kernel.

    nbytes = x.size * x.dtype.itemsize
    n_chunks = int(
        min(_MAX_DMA_CHUNKS, max(1, nbytes // _MIN_BYTES_PER_CHUNK), x.shape[0])
    )
    splits = _chunk_splits(x.shape[0], n_chunks)

    return pl.pallas_call(
        _make_bypass_kernel(splits),
        out_shape=jax.ShapeDtypeStruct(x.shape, x.dtype),
        in_specs=[pl.BlockSpec(memory_space=pl.ANY)],
        out_specs=pl.BlockSpec(memory_space=pl.ANY),
        scratch_shapes=[pltpu.SemaphoreType.DMA((len(splits),))],
        compiler_params=pltpu.CompilerParams(has_side_effects=True),
        cost_estimate=pl.CostEstimate(
            flops=0,
            transcendentals=0,
            bytes_accessed=2 * nbytes,
        ),
    )(x)


bypass = jax.jit(_bypass_impl)


if __name__ == "__main__":
    key = jax.random.PRNGKey(0)
    # Small NCHW input, matching what a conv-style module would consume.
    x = jax.random.normal(key, (2, 4, 16, 16), dtype=jnp.float32)
    x_host = np.asarray(x)  # host snapshot for comparison

    y = bypass(x)
    jax.block_until_ready(y)

    assert y.shape == x.shape, (y.shape, x.shape)
    assert y.dtype == x.dtype, (y.dtype, x.dtype)
    assert np.array_equal(np.asarray(y), x_host), "ByPass kernel did not reproduce identity"

    print("KERNEL_OK")
</pallas_src>

<mosaic_0001>
module attributes {stable_mosaic.version = 11 : i64} {
  func.func @kernel(%arg0: memref<2x4x16x16xf32, #tpu.memory_space<any>>, %arg1: memref<2x4x16x16xf32, #tpu.memory_space<any>>, %arg2: memref<1x!tpu.dma_semaphore, #tpu.memory_space<semaphore_mem>>) attributes {dimension_semantics = [], scalar_prefetch = 0 : i64, scratch_operands = 1 : i64, tpu.core_type = #tpu.core_type<tc>} {
    %c0_i32 = arith.constant 0 : i32
    %c0_i32_0 = arith.constant 0 : i32
    %c0_i32_1 = arith.constant 0 : i32
    %c0_i32_2 = arith.constant 0 : i32
    %c0_i32_3 = arith.constant 0 : i32
    %0 = tpu.memref_slice %arg0[%c0_i32_0, %c0_i32_1, %c0_i32_2, %c0_i32_3] : memref<2x4x16x16xf32, #tpu.memory_space<any>> -> memref<2x4x16x16xf32, #tpu.memory_space<any>>
    %c0_i32_4 = arith.constant 0 : i32
    %c0_i32_5 = arith.constant 0 : i32
    %c0_i32_6 = arith.constant 0 : i32
    %c0_i32_7 = arith.constant 0 : i32
    %1 = tpu.memref_slice %arg1[%c0_i32_4, %c0_i32_5, %c0_i32_6, %c0_i32_7] : memref<2x4x16x16xf32, #tpu.memory_space<any>> -> memref<2x4x16x16xf32, #tpu.memory_space<any>>
    %2 = tpu.memref_slice %arg2[%c0_i32] : memref<1x!tpu.dma_semaphore, #tpu.memory_space<semaphore_mem>> -> memref<1x!tpu.dma_semaphore, #tpu.memory_space<semaphore_mem>>
    %3 = tpu.memref_squeeze %2 : memref<1x!tpu.dma_semaphore, #tpu.memory_space<semaphore_mem>> -> memref<!tpu.dma_semaphore, #tpu.memory_space<semaphore_mem>>
    tpu.enqueue_dma source(%0 : memref<2x4x16x16xf32, #tpu.memory_space<any>>) target(%1 : memref<2x4x16x16xf32, #tpu.memory_space<any>>) target_semaphore(%3 : memref<!tpu.dma_semaphore, #tpu.memory_space<semaphore_mem>>)
    %c0_i32_8 = arith.constant 0 : i32
    %c0_i32_9 = arith.constant 0 : i32
    %c0_i32_10 = arith.constant 0 : i32
    %c0_i32_11 = arith.constant 0 : i32
    %c0_i32_12 = arith.constant 0 : i32
    %4 = tpu.memref_slice %arg0[%c0_i32_9, %c0_i32_10, %c0_i32_11, %c0_i32_12] : memref<2x4x16x16xf32, #tpu.memory_space<any>> -> memref<2x4x16x16xf32, #tpu.memory_space<any>>
    %c0_i32_13 = arith.constant 0 : i32
    %c0_i32_14 = arith.constant 0 : i32
    %c0_i32_15 = arith.constant 0 : i32
    %c0_i32_16 = arith.constant 0 : i32
    %5 = tpu.memref_slice %arg1[%c0_i32_13, %c0_i32_14, %c0_i32_15, %c0_i32_16] : memref<2x4x16x16xf32, #tpu.memory_space<any>> -> memref<2x4x16x16xf32, #tpu.memory_space<any>>
    %6 = tpu.memref_slice %arg2[%c0_i32_8] : memref<1x!tpu.dma_semaphore, #tpu.memory_space<semaphore_mem>> -> memref<1x!tpu.dma_semaphore, #tpu.memory_space<semaphore_mem>>
    %7 = tpu.memref_squeeze %6 : memref<1x!tpu.dma_semaphore, #tpu.memory_space<semaphore_mem>> -> memref<!tpu.dma_semaphore, #tpu.memory_space<semaphore_mem>>
    tpu.wait_dma2 semaphore(%7 : memref<!tpu.dma_semaphore, #tpu.memory_space<semaphore_mem>>) src(%4 : memref<2x4x16x16xf32, #tpu.memory_space<any>>) dst(%5 : memref<2x4x16x16xf32, #tpu.memory_space<any>>)
    return
  }
}

</mosaic_0001>

<bundles_post_ra>
// kernel: _bypass_impl.1
= control target key start
LH: loop header
LB: loop body
LE: loop exit
PB: predicated region body
PF: predicated region fallthrough
CT: control target
= control target key end

     0   :  { %s34_s12 = smov [#allocation2]   ;;  %s35_s13 = smov [#allocation3]   ;;  %s53_s0 = inlined_call_operand.hbm [shape: f32[2,4,16,16], index: 0, kind: input, shape index: {}]   ;;  %s54_s1 = inlined_call_operand.hbm [shape: f32[2,4,16,16], index: 1, kind: output, shape index: {}]  }
   0x1   :  { %s10_s8 = sshll.u32 %s53_s0, 4  ;;  %s12_s11 = sshll.u32 %s54_s1, 4  ;;  %s11_s8 = int_to_ptr.hbm [resolvable:$true] %s10_s8  ;;  %s13_s11 = int_to_ptr.hbm [resolvable:$true] %s12_s11 }
   0x2   :  { %s36_s14 = smov 0  }
   0x3   :  { %16 = dma.general %s11_s8, 2048, %s13_s11, %s34_s12, %s35_s13, [#allocation4], %s36_s14, 0  }
   0x4   :  { %32 = dma.done.wait [#allocation2], 2048 }
   0x5   :  { %33 = vsyncadd [#allocation2], 4294965248 }
   0x6   :  { %22 = vsyncmov [#allocation2] }
   0x9   :  { %s23_s15 = vpop.sfrf %22 }
   0xa   :  { %p28_p0 = scmp.ne.s32.totalorder %s23_s15, 0 }
   0xc   :  { %27 = shalt.err (%p28_p0)  }

</bundles_post_ra>
